<compile_context>
chip_gen: v7x
topology: tpu7x:2x2x1
jax: 0.10.0
libtpu: 0.0.40
codegen_flags: <defaults>
</compile_context>

<pallas_src>
import jax
import jax.numpy as jnp
from jax.experimental import pallas as pl
from jax.experimental.pallas import tpu as pltpu


def decoder_kernel(x_ref, w1_ref, scale_ref, shift_ref,
                   wm_ref, bm_ref, wv_ref, bv_ref,
                   m_ref, v_ref):
    # FC layer: Linear -> BatchNorm1d(eval) -> ReLU (dropout is identity in eval).
    # x is read from HBM as f32 and cast to bf16 in-register for the MXU.
    x = x_ref[...].astype(w1_ref.dtype)
    h = jnp.dot(x, w1_ref[...], preferred_element_type=jnp.float32)
    # BN(eval): (x@w1 + b1)*bn_scale + bn_shift == (x@w1)*bn_scale + shift
    h = jnp.maximum(h * scale_ref[...] + shift_ref[...], 0.0)

    hb = h.astype(wm_ref.dtype)
    # Mean head.
    m = jnp.dot(hb, wm_ref[...], preferred_element_type=jnp.float32) + bm_ref[...]
    m_ref[...] = m.astype(m_ref.dtype)
    # Var head: exp() only on the var logits (EUP slot, effectively free).
    v = jnp.dot(hb, wv_ref[...], preferred_element_type=jnp.float32) + bv_ref[...]
    v_ref[...] = jnp.exp(v).astype(v_ref.dtype)


def decoder_forward(x_cat, params, *, tile_b=512,
                    compute_dtype=jnp.bfloat16, out_dtype=jnp.float32):
    """x_cat: (B, n_input + sum(n_cat_list)) float32, cats already one-hot concatenated.

    Returns (p_m, p_v) with p_v = exp(var_decoder(h)) > 0.
    """
    (w1, b1, bn_scale, bn_shift, wm, bm, wv, bv) = params
    B, n_in_tot = x_cat.shape
    n_hidden = w1.shape[1]
    n_output = wm.shape[1]

    # --- parameter prep (host/XLA side, once) --------------------------------
    # Keep w1 unfolded in bf16; bn_scale applied in f32 post-matmul in-kernel.
    w1_c = w1.astype(compute_dtype)                          # (n_in_tot, n_hidden)
    scale = bn_scale.astype(jnp.float32)                     # (1, n_hidden)
    shift = (b1 * bn_scale + bn_shift).astype(jnp.float32)   # (1, n_hidden)
    wm_c = wm.astype(compute_dtype)                          # (n_hidden, n_output)
    wv_c = wv.astype(compute_dtype)                          # (n_hidden, n_output)
    bm_f = bm.astype(jnp.float32)                            # (1, n_output)
    bv_f = bv.astype(jnp.float32)                            # (1, n_output)
    # NOTE: x_cat is NOT cast here -- the kernel casts it (saves one HBM pass).

    # --- tiling --------------------------------------------------------------
    tile_b = min(tile_b, B)
    if B >= 32:
        # Ensure >=2 grid steps so v7x can shard the parallel axis over 2 TCs.
        tile_b = min(tile_b, (B // 2 // 16) * 16)
    if tile_b < B:
        tile_b = max(16, (tile_b // 16) * 16)   # bf16 packs 16 rows / vreg sublane
    n_tiles = pl.cdiv(B, tile_b)
    B_pad = n_tiles * tile_b
    if B_pad != B:
        x_cat = jnp.pad(x_cat, ((0, B_pad - B), (0, 0)))

    grid = (n_tiles,)
    full = lambda arr: pl.BlockSpec(arr.shape, lambda i: (0, 0))

    p_m, p_v = pl.pallas_call(
        decoder_kernel,
        out_shape=(jax.ShapeDtypeStruct((B_pad, n_output), out_dtype),
                   jax.ShapeDtypeStruct((B_pad, n_output), out_dtype)),
        grid_spec=pltpu.PrefetchScalarGridSpec(
            num_scalar_prefetch=0,
            grid=grid,
            in_specs=[
                pl.BlockSpec((tile_b, n_in_tot), lambda i: (i, 0)),  # x (batch-tiled)
                full(w1_c),    # first-layer weights (resident across grid)
                full(scale),   # BN scale (f32)
                full(shift),   # folded BN shift + first-layer bias (f32)
                full(wm_c),    # mean-head weights
                full(bm_f),    # mean-head bias
                full(wv_c),    # var-head weights
                full(bv_f),    # var-head bias
            ],
            out_specs=(pl.BlockSpec((tile_b, n_output), lambda i: (i, 0)),
                       pl.BlockSpec((tile_b, n_output), lambda i: (i, 0))),
        ),
        compiler_params=pltpu.CompilerParams(
            dimension_semantics=("parallel",),
            vmem_limit_bytes=32 * 1024 * 1024,
        ),
    )(x_cat, w1_c, scale, shift, wm_c, bm_f, wv_c, bv_f)

    if B_pad != B:
        p_m = p_m[:B]
        p_v = p_v[:B]
    return p_m, p_v


def init_params(key, n_in_tot, n_hidden, n_output):
    """Deterministic synthetic parameter init (matches the module's shapes)."""
    ks = jax.random.split(key, 8)
    scale = 0.05
    w1 = jax.random.normal(ks[0], (n_in_tot, n_hidden), jnp.float32) * scale
    b1 = jax.random.normal(ks[1], (1, n_hidden), jnp.float32) * scale
    # BatchNorm1d in eval mode folded into affine scale/shift:
    #   y = (x - running_mean) / sqrt(running_var + eps) * gamma + beta
    gamma = 1.0 + 0.1 * jax.random.normal(ks[2], (1, n_hidden), jnp.float32)
    beta = 0.1 * jax.random.normal(ks[3], (1, n_hidden), jnp.float32)
    running_mean = 0.05 * jax.random.normal(ks[4], (1, n_hidden), jnp.float32)
    running_var = 1.0 + 0.1 * jnp.abs(jax.random.normal(ks[5], (1, n_hidden), jnp.float32))
    eps = 1e-3
    bn_scale = gamma / jnp.sqrt(running_var + eps)
    bn_shift = beta - running_mean * bn_scale
    wm = jax.random.normal(ks[6], (n_hidden, n_output), jnp.float32) * scale
    bm = jnp.zeros((1, n_output), jnp.float32)
    wv = jax.random.normal(ks[7], (n_hidden, n_output), jnp.float32) * scale
    bv = jnp.zeros((1, n_output), jnp.float32)
    return (w1, b1, bn_scale, bn_shift, wm, bm, wv, bv)


def reference_forward(x_cat, params):
    """Pure-JAX f32 reference of the module's eval forward."""
    (w1, b1, bn_scale, bn_shift, wm, bm, wv, bv) = params
    h = x_cat @ w1 + b1
    h = h * bn_scale + bn_shift
    h = jnp.maximum(h, 0.0)
    return h @ wm + bm, jnp.exp(h @ wv + bv)


if __name__ == "__main__":
    key = jax.random.PRNGKey(0)

    # Small shapes consistent with the module.
    batch = 16
    n_input = 16          # latent dim
    n_hidden = 128
    n_output = 32         # data dim
    n_cat_list = [3]      # one categorical covariate with 3 categories
    n_in_tot = n_input + sum(n_cat_list)

    k_x, k_cat, k_p = jax.random.split(key, 3)
    x = jax.random.normal(k_x, (batch, n_input), jnp.float32)
    cats = jax.random.randint(k_cat, (batch,), 0, n_cat_list[0])
    cat_onehot = jax.nn.one_hot(cats, n_cat_list[0], dtype=jnp.float32)
    # FCLayers injects covariates by concatenating one-hot encodings to x (glue).
    # TODO(synk): could pass integer categories via scalar prefetch + a small
    # resident w1 row table instead of one-hot concat; kept as concat for parity.
    x_cat = jnp.concatenate([x, cat_onehot], axis=-1)

    params = init_params(k_p, n_in_tot, n_hidden, n_output)

    p_m, p_v = decoder_forward(x_cat, params)   # tile_b auto-capped to B=16
    p_m = jax.block_until_ready(p_m)
    p_v = jax.block_until_ready(p_v)

    # Correctness check against a pure-JAX f32 reference.
    # Tolerance loosened because matmul operands are bf16 (f32 accumulation);
    # exp on the var head amplifies rounding slightly.
    ref_m, ref_v = reference_forward(x_cat, params)
    assert p_m.shape == (batch, n_output) and p_v.shape == (batch, n_output)
    assert jnp.allclose(p_m, ref_m, atol=2e-2, rtol=2e-2)
    assert jnp.allclose(p_v, ref_v, atol=2e-2, rtol=2e-2)
    assert bool(jnp.all(p_v > 0.0))

    print("KERNEL_OK")
</pallas_src>

<mosaic_0001>
module attributes {stable_mosaic.version = 11 : i64} {
  func.func @decoder_kernel(%arg0: i32, %arg1: memref<16x19xf32, #tpu.memory_space<vmem>>, %arg2: memref<19x128xbf16, #tpu.memory_space<vmem>>, %arg3: memref<1x128xf32, #tpu.memory_space<vmem>>, %arg4: memref<1x128xf32, #tpu.memory_space<vmem>>, %arg5: memref<128x32xbf16, #tpu.memory_space<vmem>>, %arg6: memref<1x32xf32, #tpu.memory_space<vmem>>, %arg7: memref<128x32xbf16, #tpu.memory_space<vmem>>, %arg8: memref<1x32xf32, #tpu.memory_space<vmem>>, %arg9: memref<16x32xf32, #tpu.memory_space<vmem>>, %arg10: memref<16x32xf32, #tpu.memory_space<vmem>>) attributes {dimension_semantics = [#tpu.dimension_semantics<parallel>], iteration_bounds = array<i64: 1>, scalar_prefetch = 0 : i64, scratch_operands = 0 : i64, tpu.core_type = #tpu.core_type<tc>, window_params = [{transform_indices = @transform_0, window_bounds = array<i64: 16, 19>}, {pipeline_mode = #tpu.pipeline_mode<synchronous>, transform_indices = @transform_1, window_bounds = array<i64: 19, 128>}, {pipeline_mode = #tpu.pipeline_mode<synchronous>, transform_indices = @transform_2, window_bounds = array<i64: 1, 128>}, {pipeline_mode = #tpu.pipeline_mode<synchronous>, transform_indices = @transform_3, window_bounds = array<i64: 1, 128>}, {pipeline_mode = #tpu.pipeline_mode<synchronous>, transform_indices = @transform_4, window_bounds = array<i64: 128, 32>}, {pipeline_mode = #tpu.pipeline_mode<synchronous>, transform_indices = @transform_5, window_bounds = array<i64: 1, 32>}, {pipeline_mode = #tpu.pipeline_mode<synchronous>, transform_indices = @transform_6, window_bounds = array<i64: 128, 32>}, {pipeline_mode = #tpu.pipeline_mode<synchronous>, transform_indices = @transform_7, window_bounds = array<i64: 1, 32>}, {transform_indices = @transform_8, window_bounds = array<i64: 16, 32>}, {transform_indices = @transform_9, window_bounds = array<i64: 16, 32>}]} {
    %c0 = arith.constant 0 : index
    %c0_0 = arith.constant 0 : index
    %0 = vector.load %arg1[%c0, %c0_0] : memref<16x19xf32, #tpu.memory_space<vmem>>, vector<16x19xf32>
    %1 = arith.truncf %0 : vector<16x19xf32> to vector<16x19xbf16>
    %c0_1 = arith.constant 0 : index
    %c0_2 = arith.constant 0 : index
    %2 = vector.load %arg2[%c0_1, %c0_2] : memref<19x128xbf16, #tpu.memory_space<vmem>>, vector<19x128xbf16>
    %cst = arith.constant dense<0.000000e+00> : vector<16x128xf32>
    %3 = tpu.matmul %1, %2, %cst {dimension_numbers = #tpu.dot_dimension_numbers<[1], [0], [0], [1], [0, 0, 1, 1], [], []>} : vector<16x19xbf16>, vector<19x128xbf16>, vector<16x128xf32> -> vector<16x128xf32>
    %c0_3 = arith.constant 0 : index
    %c0_4 = arith.constant 0 : index
    %4 = vector.load %arg3[%c0_3, %c0_4] : memref<1x128xf32, #tpu.memory_space<vmem>>, vector<1x128xf32>
    %5 = vector.broadcast %4 : vector<1x128xf32> to vector<16x128xf32>
    %6 = arith.mulf %3, %5 : vector<16x128xf32>
    %c0_5 = arith.constant 0 : index
    %c0_6 = arith.constant 0 : index
    %7 = vector.load %arg4[%c0_5, %c0_6] : memref<1x128xf32, #tpu.memory_space<vmem>>, vector<1x128xf32>
    %8 = vector.broadcast %7 : vector<1x128xf32> to vector<16x128xf32>
    %9 = arith.addf %6, %8 : vector<16x128xf32>
    %cst_7 = arith.constant 0.000000e+00 : f32
    %10 = vector.broadcast %cst_7 : f32 to vector<16x128xf32>
    %11 = arith.maximumf %9, %10 : vector<16x128xf32>
    %12 = arith.truncf %11 : vector<16x128xf32> to vector<16x128xbf16>
    %c0_8 = arith.constant 0 : index
    %c0_9 = arith.constant 0 : index
    %13 = vector.load %arg5[%c0_8, %c0_9] : memref<128x32xbf16, #tpu.memory_space<vmem>>, vector<128x32xbf16>
    %cst_10 = arith.constant dense<0.000000e+00> : vector<16x32xf32>
    %14 = tpu.matmul %12, %13, %cst_10 {dimension_numbers = #tpu.dot_dimension_numbers<[1], [0], [0], [1], [0, 0, 1, 1], [], []>} : vector<16x128xbf16>, vector<128x32xbf16>, vector<16x32xf32> -> vector<16x32xf32>
    %c0_11 = arith.constant 0 : index
    %c0_12 = arith.constant 0 : index
    %15 = vector.load %arg6[%c0_11, %c0_12] : memref<1x32xf32, #tpu.memory_space<vmem>>, vector<1x32xf32>
    %16 = vector.broadcast %15 : vector<1x32xf32> to vector<16x32xf32>
    %17 = arith.addf %14, %16 : vector<16x32xf32>
    %c0_13 = arith.constant 0 : index
    %c0_14 = arith.constant 0 : index
    %18 = vector.load %arg9[%c0_13, %c0_14] : memref<16x32xf32, #tpu.memory_space<vmem>>, vector<16x32xf32>
    tpu.vector_store %arg9[%c0_13, %c0_14], %17 {strides = array<i32>} : memref<16x32xf32, #tpu.memory_space<vmem>>, vector<16x32xf32>,
    %c0_15 = arith.constant 0 : index
    %c0_16 = arith.constant 0 : index
    %19 = vector.load %arg7[%c0_15, %c0_16] : memref<128x32xbf16, #tpu.memory_space<vmem>>, vector<128x32xbf16>
    %cst_17 = arith.constant dense<0.000000e+00> : vector<16x32xf32>
    %20 = tpu.matmul %12, %19, %cst_17 {dimension_numbers = #tpu.dot_dimension_numbers<[1], [0], [0], [1], [0, 0, 1, 1], [], []>} : vector<16x128xbf16>, vector<128x32xbf16>, vector<16x32xf32> -> vector<16x32xf32>
    %c0_18 = arith.constant 0 : index
    %c0_19 = arith.constant 0 : index
    %21 = vector.load %arg8[%c0_18, %c0_19] : memref<1x32xf32, #tpu.memory_space<vmem>>, vector<1x32xf32>
    %22 = vector.broadcast %21 : vector<1x32xf32> to vector<16x32xf32>
    %23 = arith.addf %20, %22 : vector<16x32xf32>
    %24 = math.exp %23 : vector<16x32xf32>
    %c0_20 = arith.constant 0 : index
    %c0_21 = arith.constant 0 : index
    %25 = vector.load %arg10[%c0_20, %c0_21] : memref<16x32xf32, #tpu.memory_space<vmem>>, vector<16x32xf32>
    tpu.vector_store %arg10[%c0_20, %c0_21], %24 {strides = array<i32>} : memref<16x32xf32, #tpu.memory_space<vmem>>, vector<16x32xf32>,
    return
  }
  func.func @transform_0(%arg0: i32) -> (i32, i32) {
    %c0_i32 = arith.constant 0 : i32
    %c0_i32_0 = arith.constant 0 : i32
    return %arg0, %c0_i32 : i32, i32
  }
  func.func @transform_1(%arg0: i32) -> (i32, i32) {
    %c0_i32 = arith.constant 0 : i32
    %c0_i32_0 = arith.constant 0 : i32
    %c0_i32_1 = arith.constant 0 : i32
    return %c0_i32, %c0_i32_0 : i32, i32
  }
  func.func @transform_2(%arg0: i32) -> (i32, i32) {
    %c0_i32 = arith.constant 0 : i32
    %c0_i32_0 = arith.constant 0 : i32
    %c0_i32_1 = arith.constant 0 : i32
    return %c0_i32, %c0_i32_0 : i32, i32
  }
  func.func @transform_3(%arg0: i32) -> (i32, i32) {
    %c0_i32 = arith.constant 0 : i32
    %c0_i32_0 = arith.constant 0 : i32
    %c0_i32_1 = arith.constant 0 : i32
    return %c0_i32, %c0_i32_0 : i32, i32
  }
  func.func @transform_4(%arg0: i32) -> (i32, i32) {
    %c0_i32 = arith.constant 0 : i32
    %c0_i32_0 = arith.constant 0 : i32
    %c0_i32_1 = arith.constant 0 : i32
    return %c0_i32, %c0_i32_0 : i32, i32
  }
  func.func @transform_5(%arg0: i32) -> (i32, i32) {
    %c0_i32 = arith.constant 0 : i32
    %c0_i32_0 = arith.constant 0 : i32
    %c0_i32_1 = arith.constant 0 : i32
    return %c0_i32, %c0_i32_0 : i32, i32
  }
  func.func @transform_6(%arg0: i32) -> (i32, i32) {
    %c0_i32 = arith.constant 0 : i32
    %c0_i32_0 = arith.constant 0 : i32
    %c0_i32_1 = arith.constant 0 : i32
    return %c0_i32, %c0_i32_0 : i32, i32
  }
  func.func @transform_7(%arg0: i32) -> (i32, i32) {
    %c0_i32 = arith.constant 0 : i32
    %c0_i32_0 = arith.constant 0 : i32
    %c0_i32_1 = arith.constant 0 : i32
    return %c0_i32, %c0_i32_0 : i32, i32
  }
  func.func @transform_8(%arg0: i32) -> (i32, i32) {
    %c0_i32 = arith.constant 0 : i32
    %c0_i32_0 = arith.constant 0 : i32
    return %arg0, %c0_i32 : i32, i32
  }
  func.func @transform_9(%arg0: i32) -> (i32, i32) {
    %c0_i32 = arith.constant 0 : i32
    %c0_i32_0 = arith.constant 0 : i32
    return %arg0, %c0_i32 : i32, i32
  }
}

</mosaic_0001>

<bundles_post_ra>
// kernel: tpu_custom_call.1
= control target key start
LH: loop header
LB: loop body
LE: loop exit
PB: predicated region body
PF: predicated region fallthrough
CT: control target
= control target key end

     0   :  { %15 = vsyncpa [#allocation3], 0  ;;  %v556_v1 = vmov 0.0   ;;  %vm53_vm0 = vcmask 1040384   ;;  %vm54_vm1 = vcmask 1041408   ;;  %v557_v5 = vmov 65535   ;;  %s737_s0 = inlined_call_operand.vmem [shape: f32[16,19], index: 0, kind: input, shape index: {}]   ;;  %s738_s1 = inlined_call_operand.vmem [shape: bf16[19,128], index: 1, kind: input, shape index: {}]   ;;  %s739_s2 = inlined_call_operand.vmem [shape: f32[1,128], index: 2, kind: input, shape index: {}]   ;;  %s740_s3 = inlined_call_operand.vmem [shape: f32[1,128], index: 3, kind: input, shape index: {}]   ;;  %s741_s4 = inlined_call_operand.vmem [shape: bf16[128,32], index: 4, kind: input, shape index: {}]   ;;  %s742_s5 = inlined_call_operand.vmem [shape: f32[1,32], index: 5, kind: input, shape index: {}]   ;;  %s743_s6 = inlined_call_operand.vmem [shape: bf16[128,32], index: 6, kind: input, shape index: {}]   ;;  %s744_s7 = inlined_call_operand.vmem [shape: f32[1,32], index: 7, kind: input, shape index: {}]   ;;  %s745_s8 = inlined_call_operand.hbm [shape: f32[16,32], index: 8, kind: output, shape index: {0}]   ;;  %s746_s9 = inlined_call_operand.hbm [shape: f32[16,32], index: 9, kind: output, shape index: {1}]  }
   0x1   :  { %v486_v0 = vld [vmem:[%s738_s1] sm:$0xff]   ;;  %431 = vmatprep.subr.bf16.mxu0 %v556_v1  ;;  %v487_v2 = vld [vmem:[%s738_s1 + $0x8] ss:$0 sps:$4 sm:$0x33]   ;;  %439 = vmatprep.subr.bf16.mxu1 %v556_v1  ;;  %v55_v6 = vsel %vm53_vm0, 4294967295, %v557_v5  ;;  %vm558_vm2 = vmmov 0  }
   0x2   :  { %432 = vmatpush3.bf16.msra.mxu0 %v486_v0  ;;  %v34_v3 = vld [vmem:[%s737_s0] sm:$0xff]  ;;  %v35_v4 = vld [vmem:[%s737_s0 + $0x8] sm:$0xff]  ;;  %435 = vmatprep.mubr.msk.bf16.mxu0 %vm558_vm2, %v556_v1  ;;  %v56_v8 = vsel %vm54_vm1, %v55_v6, 0  ;;  %vm49_vm3 = vcmask 154624   ;;  %v492_v13 = vld [vmem:[%s741_s4 + $0x10] sm:$0xff]  }
   0x3   :  { %433 = vmatprep.subr.bf16.mxu0 %v556_v1  ;;  %v488_v7 = vld [vmem:[%s741_s4] sm:$0xff]   ;;  %455 = vmatprep.mubr.msk.bf16.mxu1 %vm558_vm2, %v556_v1  ;;  %v58_v9 = vand.u32 %v487_v2, %v56_v8  ;;  %v490_v10 = vld [vmem:[%s741_s4 + $0x8] sm:$0xff]   ;;  %v36_v11 = vpack.c.bf16 %v35_v4, %v34_v3  ;;  %v494_v15 = vld [vmem:[%s741_s4 + $0x18] sm:$0xff]  }
   0x4   :  { %440 = vmatpush3.bf16.msra.mxu1 %v488_v7  ;;  %v489_v12 = vld [vmem:[%s743_s6] sm:$0xff]   ;;  %v491_v14 = vld [vmem:[%s743_s6 + $0x8] sm:$0xff]   ;;  %v493_v16 = vld [vmem:[%s743_s6 + $0x10] sm:$0xff]  }
   0x5   :  { %441 = vmatprep.subr.bf16.mxu1 %v556_v1  ;;  %v496_v17 = vld [vmem:[%s741_s4 + $0x20] sm:$0xff]  }
   0x6   :  { %434 = vmatpush3.bf16.msra.mxu0 %v58_v9 }
   0x7   :  { %459 = vmatprep.subr.bf16.mxu0 %v556_v1 }
   0x8   :  { %442 = vmatpush3.bf16.msra.mxu1 %v490_v10 }
   0x9   :  { %436 = vmatmul.mubr.msk.bf16.vlgmr.msra.gmra.mrb[0].mxu0 %vm49_vm3, %v36_v11  ;;  %443 = vmatprep.subr.bf16.mxu1 %v556_v1 }
   0xa   :  { %460 = vmatpush3.bf16.msra.mxu0 %v489_v12  ;;  %475 = vmatprep.mubr.msk.bf16.mxu0 %vm558_vm2, %v556_v1 }
   0xb   :  { %461 = vmatprep.subr.bf16.mxu0 %v556_v1 }
   0xc   :  { %444 = vmatpush3.bf16.msra.mxu1 %v492_v13 }
   0xd   :  { %445 = vmatprep.subr.bf16.mxu1 %v556_v1 }
   0xe   :  { %462 = vmatpush3.bf16.msra.mxu0 %v491_v14 }
   0xf   :  { %463 = vmatprep.subr.bf16.mxu0 %v556_v1 }
  0x10   :  { %446 = vmatpush3.bf16.msra.mxu1 %v494_v15 }
  0x11   :  { %16 = vsyncpa [#allocation5], 0  ;;  %447 = vmatprep.subr.bf16.mxu1 %v556_v1  ;;  %v495_v18 = vld [vmem:[%s743_s6 + $0x18] sm:$0xff]   ;;  %v497_v19 = vld [vmem:[%s743_s6 + $0x20] sm:$0xff]   ;;  %vm234_vm4 = vcmask 261120  }
  0x12   :  { %464 = vmatpush3.bf16.msra.mxu0 %v493_v16  ;;  %v498_v20 = vld [vmem:[%s741_s4 + $0x28] sm:$0xff]   ;;  %v500_v22 = vld [vmem:[%s741_s4 + $0x30] sm:$0xff]   ;;  %v502_v24 = vld [vmem:[%s741_s4 + $0x38] sm:$0xff]  }
  0x13   :  { %465 = vmatprep.subr.bf16.mxu0 %v556_v1  ;;  %v499_v21 = vld [vmem:[%s743_s6 + $0x28] sm:$0xff]   ;;  %v501_v23 = vld [vmem:[%s743_s6 + $0x30] sm:$0xff]   ;;  %v503_v25 = vld [vmem:[%s743_s6 + $0x38] sm:$0xff]  }
  0x14   :  { %448 = vmatpush3.bf16.msra.mxu1 %v496_v17  ;;  %v390_v26 = vld [vmem:[%s739_s2] ss:$0 sm:$0xff] }
  0x15   :  { %449 = vmatprep.subr.bf16.mxu1 %v556_v1  ;;  %v391_v28 = vld [vmem:[%s740_s3] ss:$0 sm:$0xff]  ;;  %s559_s3 = smov [#allocation2]  }
  0x16   :  { %466 = vmatpush3.bf16.msra.mxu0 %v495_v18  ;;  %v392_v39 = vld [vmem:[%s742_s5] ss:$0 sm:$0xff]  ;;  %s360_s29 = sshll.u32 %s559_s3, 4  ;;  %s361_s29 = int_to_ptr.vmem [resolvable:$true] %s360_s29 }
  0x17   :  { %467 = vmatprep.subr.bf16.mxu0 %v556_v1  ;;  %v401_v40 = vld [vmem:[%s744_s7] ss:$0 sm:$0xff]  ;;  %s508_s5 = scalar_lea.vmem %s361_s29, 256  ;;  %p513_p1 = scmp.lt.s32.totalorder %s361_s29, %s361_s29 }
  0x18   :  { %450 = vmatpush3.bf16.msra.mxu1 %v498_v20  ;;  %p509_p0 = scmp.ne.s32.totalorder %s361_s29, %s508_s5  ;;  %p514_p2 = scmp.lt.s32.totalorder %s508_s5, %s508_s5 }
  0x19   :  { %451 = vmatprep.subr.bf16.mxu1 %v556_v1 }
  0x1a   :  { %468 = vmatpush3.bf16.msra.mxu0 %v497_v19  ;;  %p515_p3 = por %p514_p2, %p513_p1 }
  0x1b   :  { %469 = vmatprep.subr.bf16.mxu0 %v556_v1 }
  0x1c   :  { %452 = vmatpush3.bf16.msra.mxu1 %v500_v22  ;;  %p516_p4 = pnand %p515_p3, %p509_p0 }
  0x1d   :  { %453 = vmatprep.subr.bf16.mxu1 %v556_v1 }
  0x1e   :  { %470 = vmatpush3.bf16.msra.mxu0 %v499_v21 }
  0x1f   :  { %471 = vmatprep.subr.bf16.mxu0 %v556_v1 }
  0x20   :  { %454 = vmatpush3.bf16.msra.mxu1 %v502_v24 }
  0x22   :  { %472 = vmatpush3.bf16.msra.mxu0 %v501_v23 }
  0x23   :  { %473 = vmatprep.subr.bf16.mxu0 %v556_v1 }
  0x26   :  { %474 = vmatpush3.bf16.msra.mxu0 %v503_v25 }
  0xdc   :  { %v94_v27 = vpop.f32.mrb[0].mxu0 }
  0xdd   :  { %v108_v29 = vmul.f32 %v390_v26, %v94_v27  ;;  %v437_v30 = vpop.f32.mrb[1].mxu0 }
  0xde   :  { %v97_v31 = vpop.f32.mrb[2].mxu0 }
  0xdf   :  { %v117_v32 = vadd.f32 %v391_v28, %v108_v29  ;;  %v109_v33 = vmul.f32 %v390_v26, %v97_v31  ;;  %v438_v34 = vpop.f32.mrb[3].mxu0 }
  0xe1   :  { %v118_v35 = vadd.f32 %v391_v28, %v109_v33  ;;  %v119_v36 = vmax.f32 %v117_v32, 0.0 }
  0xe3   :  { %v120_v37 = vmax.f32 %v118_v35, 0.0 }
  0xe5   :  { %v121_v38 = vpack.c.bf16 %v120_v37, %v119_v36 }
  0xe7   :  { %456 = vmatmul.mubr.bf16.vlgmr.msra.gmra.mrb[0].mxu1 %v121_v38  ;;  %476 = vmatmul.mubr.bf16.vlgmr.msra.gmra.mrb[4].mxu0 %v121_v38 }
 0x1ba   :  { %v227_v41 = vpop.f32.mrb[0].mxu1  ;;  %v342_v42 = vpop.f32.mrb[4].mxu0 }
 0x1bb   :  { %v228_v43 = vadd.f32 %v392_v39, %v227_v41  ;;  %v343_v44 = vadd.f32 %v401_v40, %v342_v42  ;;  %v457_v45 = vpop.f32.mrb[1].mxu1  ;;  %v477_v46 = vpop.f32.mrb[5].mxu0 }
 0x1bc   :  { %v230_v47 = vpop.f32.mrb[2].mxu1  ;;  %v345_v48 = vpop.f32.mrb[6].mxu0 }
 0x1bd   :  { %235 = vst.msk [vmem:[#allocation2] sm:$0xff] %vm234_vm4, %v228_v43  ;;  %v349_v49 = vmul.f32 1.442695, %v343_v44  ;;  %v231_v50 = vadd.f32 %v392_v39, %v230_v47  ;;  %v346_v51 = vadd.f32 %v401_v40, %v345_v48  ;;  %v458_v52 = vpop.f32.mrb[3].mxu1  ;;  %v478_v53 = vpop.f32.mrb[7].mxu0 }
 0x1bf   :  { %504 = vpow2.f32 %v349_v49  ;;  %236 = vst.msk [vmem:[#allocation2 + $0x8] sm:$0xff] %vm234_vm4, %v231_v50  ;;  %v351_v54 = vmul.f32 1.442695, %v346_v51 }
 0x1c0   :  { %519 = shalt.err (!%p516_p4)
}
 0x1c1   :  { %s520_s10 = scalar_lea.hbm %s745_s8, 256 }
 0x1c2   :  { %p521_p5 = scmp.ne.s32.totalorder %s745_s8, %s520_s10  ;;  %p524_p6 = scmp.lt.u32.totalorder %s520_s10, %s745_s8 }
 0x1c4   :  { %p526_p7 = pnand %p524_p6, %p521_p5 }
 0x1c6   :  { %529 = shalt.err (!%p526_p7)
}
 0x1c7   :  { %s560_s15 = smov 128   ;;  %s561_s16 = smov 8   ;;  %506 = vpow2.f32 %v351_v54 }
 0x1c8   :  { %366 = dma.vmem_to_hbm [thread:$0]  %s361_s29, 256, %s745_s8, [#allocation3], %s560_s15, %s560_s15, %s561_s16  }
 0x1c9   :  { %s562_s18 = smov [#allocation4]   ;;  %v505_v55 = vpop.eup %504 }
 0x1ca   :  { %s372_s0 = sshll.u32 %s562_s18, 4  ;;  %353 = vst.msk [vmem:[#allocation4] sm:$0xff] %vm234_vm4, %v505_v55  ;;  %s373_s0 = int_to_ptr.vmem [resolvable:$true] %s372_s0 }
 0x1cb   :  { %s530_s19 = scalar_lea.vmem %s373_s0, 256  ;;  %p535_p9 = scmp.lt.s32.totalorder %s373_s0, %s373_s0 }
 0x1cc   :  { %p531_p8 = scmp.ne.s32.totalorder %s373_s0, %s530_s19  ;;  %p536_p10 = scmp.lt.s32.totalorder %s530_s19, %s530_s19 }
 0x1ce   :  { %p537_p11 = por %p536_p10, %p535_p9 }
 0x1d0   :  { %p538_p12 = pnand %p537_p11, %p531_p8 }
 0x1d1   :  { %v507_v56 = vpop.eup %506 }
 0x1d2   :  { %354 = vst.msk [vmem:[#allocation4 + $0x8] sm:$0xff] %vm234_vm4, %v507_v56 }
 0x1d3   :  { %541 = shalt.err (!%p538_p12)
}
 0x1d4   :  { %s542_s8 = scalar_lea.hbm %s746_s9, 256 }
 0x1d5   :  { %p543_p13 = scmp.ne.s32.totalorder %s746_s9, %s542_s8  ;;  %p546_p0 = scmp.lt.u32.totalorder %s542_s8, %s746_s9 }
 0x1d7   :  { %p548_p1 = pnand %p546_p0, %p543_p13 }
 0x1d9   :  { %551 = shalt.err (!%p548_p1)
}
 0x1da   :  { %378 = dma.vmem_to_hbm [thread:$0]  %s373_s0, 256, %s746_s9, [#allocation5], %s560_s15, %s560_s15, %s561_s16  }
 0x1db   :  { %552 = dma.done.wait [#allocation3], 256  }
 0x1dc   :  { %553 = vsyncadd [#allocation3], 4294967040 }
 0x1dd   :  { %554 = dma.done.wait [#allocation5], 256  }
 0x1de   :  { %555 = vsyncadd [#allocation5], 4294967040 }
 0x1df   :  { %385 = vsyncpa [#allocation3], 1 }
 0x1e0   :  { %386 = vsyncpa [#allocation5], 1 }

</bundles_post_ra>
